<compile_context>
chip_gen: v7x
topology: tpu7x:2x2x1
jax: 0.10.0
libtpu: 0.0.40
codegen_flags: <defaults>
</compile_context>

<pallas_src>
import jax
import jax.numpy as jnp
from jax.experimental import pallas as pl
from jax.experimental.pallas import tpu as pltpu

jax.config.update("jax_default_matmul_precision", "highest")


def _make_fused_kernel(n_mlp_linears: int):
    """Kernel over one M-tile: full MLP + residual linear, all in VMEM."""

    def kernel(*refs):
        x_ref = refs[0]
        o_ref = refs[-1]
        wb = refs[1:-1]                    # [w0,b0, w1,b1, ..., wL,bL, wr,br]

        x = x_ref[...]                     # (tm, K) f32
        h = x
        for li in range(n_mlp_linears):
            w = wb[2 * li][...]            # (K_in, N_out) pre-transposed
            b = wb[2 * li + 1][...]        # (1,   N_out)
            h = jnp.dot(h, w, preferred_element_type=jnp.float32) + b
            if li < n_mlp_linears - 1:     # ReLU on all but the last MLP layer
                h = jnp.maximum(h, 0.0)

        wr = wb[2 * n_mlp_linears][...]    # (K, N_pad) residual weight
        br = wb[2 * n_mlp_linears + 1][...]
        y = h + jnp.dot(x, wr, preferred_element_type=jnp.float32) + br
        o_ref[...] = y.astype(o_ref.dtype)

    return kernel


def mlp_res_net_forward(params, *ars, tm: int = 1024):
    """Pallas TPU forward of MLP_res_net. Mirrors the PyTorch forward()."""
    # Flatten each arg to (B, -1) and concatenate, exactly like the module.
    flats = [a.reshape(a.shape[0], -1) for a in ars]
    x = flats[0] if len(flats) == 1 else jnp.concatenate(flats, axis=1)
    x = x.astype(jnp.float32)
    M, K = x.shape

    mlp_w, mlp_b = params["mlp_w"], params["mlp_b"]
    res_w, res_b = params["res_w"], params["res_b"]
    n_out = res_w.shape[0]
    assert mlp_w[0].shape[1] == K and res_w.shape[1] == K, "input size mismatch"

    # ---- one-time weight prep: transpose to (K, N), lane-pad the output dim.
    n_pad = ((n_out + 127) // 128) * 128
    pad_n = n_pad - n_out
    wts = [W.T.astype(jnp.float32) for W in mlp_w]
    bts = [b.reshape(1, -1).astype(jnp.float32) for b in mlp_b]
    wts[-1] = jnp.pad(wts[-1], ((0, 0), (0, pad_n)))
    bts[-1] = jnp.pad(bts[-1], ((0, 0), (0, pad_n)))
    wrt = jnp.pad(res_w.T.astype(jnp.float32), ((0, 0), (0, pad_n)))
    brt = jnp.pad(res_b.reshape(1, -1).astype(jnp.float32), ((0, 0), (0, pad_n)))
    n_lin = len(wts)

    # ---- M tiling (no host-side pad; ragged last block handled by Pallas).
    tm_eff = M if M <= tm else tm
    if tm_eff < M:
        assert tm_eff % 8 == 0, "tm must be a multiple of 8 when tiling M"
    grid_m = pl.cdiv(M, tm_eff)

    in_specs = [pl.BlockSpec((tm_eff, K), lambda i: (i, 0))]   # x tile (streams)
    operands = [x]
    for w, b in zip(wts, bts):                                 # resident weights
        in_specs.append(pl.BlockSpec(w.shape, lambda i: (0, 0)))
        in_specs.append(pl.BlockSpec(b.shape, lambda i: (0, 0)))
        operands += [w, b]
    in_specs.append(pl.BlockSpec(wrt.shape, lambda i: (0, 0)))
    in_specs.append(pl.BlockSpec(brt.shape, lambda i: (0, 0)))
    operands += [wrt, brt]
    out_spec = pl.BlockSpec((tm_eff, n_pad), lambda i: (i, 0))

    # ---- cost estimate + VMEM budget.
    w_elems = sum(int(w.size) + int(b.size) for w, b in zip(wts, bts))
    w_elems += int(wrt.size) + int(brt.size)
    mm_elems = sum(int(w.size) for w in wts) + int(wrt.size)
    flops = 2 * M * mm_elems
    bytes_accessed = 4 * (M * K + M * n_pad + w_elems)

    need = 2 * 4 * (tm_eff * K + tm_eff * n_pad) + 4 * w_elems + (2 << 20)
    ckw = {}
    if need > (16 << 20):  # only raise past the smallest (v5e) scoped default
        ckw["vmem_limit_bytes"] = int(min(need + (8 << 20), 100 << 20))

    y = pl.pallas_call(
        _make_fused_kernel(n_lin),
        out_shape=jax.ShapeDtypeStruct((M, n_pad), jnp.float32),
        grid_spec=pltpu.PrefetchScalarGridSpec(
            num_scalar_prefetch=0,
            grid=(grid_m,),
            in_specs=in_specs,
            out_specs=out_spec,
        ),
        compiler_params=pltpu.CompilerParams(
            dimension_semantics=("parallel",), **ckw),
        cost_estimate=pl.CostEstimate(
            flops=int(flops), transcendentals=0,
            bytes_accessed=int(bytes_accessed)),
    )(*operands)

    y = y[:, :n_out]
    return y[:, 0] if params["scalar_output"] else y


# ----------------------------- parameters --------------------------------- #
def init_mlp_res_net_params(key, input_size, output_size,
                            n_hidden_layers=2, n_hidden_nodes=128,
                            zero_bias=True):
    """PyTorch-layout (out_features, in_features) weights, nn.Linear-style init."""
    scalar_output = output_size == "scalar"
    n_out = 1 if scalar_output else output_size
    dims = [input_size] + [n_hidden_nodes] * n_hidden_layers + [n_out]

    def linear(k, fan_in, fan_out):
        kw, kb = jax.random.split(k)
        bound = 1.0 / (fan_in ** 0.5)
        W = jax.random.uniform(kw, (fan_out, fan_in), jnp.float32, -bound, bound)
        if zero_bias:
            b = jnp.zeros((fan_out,), jnp.float32)
        else:
            b = jax.random.uniform(kb, (fan_out,), jnp.float32, -bound, bound)
        return W, b

    keys = jax.random.split(key, len(dims))
    mlp_w, mlp_b = [], []
    for i in range(len(dims) - 1):
        W, b = linear(keys[i], dims[i], dims[i + 1])
        mlp_w.append(W)
        mlp_b.append(b)
    res_w, res_b = linear(keys[-1], input_size, n_out)
    return {"mlp_w": mlp_w, "mlp_b": mlp_b,
            "res_w": res_w, "res_b": res_b,
            "scalar_output": scalar_output}


def mlp_res_net_reference(params, *ars):
    """Pure-JAX reference matching the PyTorch forward."""
    flats = [a.reshape(a.shape[0], -1) for a in ars]
    x = flats[0] if len(flats) == 1 else jnp.concatenate(flats, axis=1)
    x = x.astype(jnp.float32)
    h = x
    n = len(params["mlp_w"])
    for i, (W, b) in enumerate(zip(params["mlp_w"], params["mlp_b"])):
        h = h @ W.T + b
        if i < n - 1:
            h = jnp.maximum(h, 0.0)
    y = h + x @ params["res_w"].T + params["res_b"]
    return y[:, 0] if params["scalar_output"] else y


# -------------------------------- demo ------------------------------------ #
if __name__ == "__main__":
    key = jax.random.PRNGKey(0)
    k_p, k_ps, k_x = jax.random.split(key, 3)

    # batch=10, per-sample features 4x8 -> flattened input_size=32
    B, C, S = 10, 4, 8
    input_size, output_size = C * S, 16
    x = jax.random.normal(k_x, (B, C, S), dtype=jnp.float32)

    params = init_mlp_res_net_params(
        k_p, input_size, output_size,
        n_hidden_layers=2, n_hidden_nodes=128, zero_bias=False)

    # 1) default tiling (single full-M block)
    y = jax.block_until_ready(mlp_res_net_forward(params, x))
    y_ref = mlp_res_net_reference(params, x)
    assert y.shape == (B, output_size)
    assert jnp.allclose(y, y_ref, atol=2e-3, rtol=2e-3), "mismatch (default tm)"

    # 2) small tile to exercise the ragged last M block (M=10, tm=8 -> grid=2)
    y2 = jax.block_until_ready(mlp_res_net_forward(params, x, tm=8))
    assert jnp.allclose(y2, y_ref, atol=2e-3, rtol=2e-3), "mismatch (ragged tm=8)"

    # 3) scalar-output variant (output_size='scalar' -> returns out[:, 0])
    params_s = init_mlp_res_net_params(
        k_ps, input_size, "scalar",
        n_hidden_layers=2, n_hidden_nodes=128, zero_bias=True)
    ys = jax.block_until_ready(mlp_res_net_forward(params_s, x))
    ys_ref = mlp_res_net_reference(params_s, x)
    assert ys.shape == (B,)
    assert jnp.allclose(ys, ys_ref, atol=2e-3, rtol=2e-3), "mismatch (scalar)"

    print("KERNEL_OK")
</pallas_src>

<mosaic_0001>
module attributes {stable_mosaic.version = 11 : i64} {
  func.func @kernel(%arg0: i32, %arg1: memref<10x32xf32, #tpu.memory_space<vmem>>, %arg2: memref<32x128xf32, #tpu.memory_space<vmem>>, %arg3: memref<1x128xf32, #tpu.memory_space<vmem>>, %arg4: memref<128x128xf32, #tpu.memory_space<vmem>>, %arg5: memref<1x128xf32, #tpu.memory_space<vmem>>, %arg6: memref<128x128xf32, #tpu.memory_space<vmem>>, %arg7: memref<1x128xf32, #tpu.memory_space<vmem>>, %arg8: memref<32x128xf32, #tpu.memory_space<vmem>>, %arg9: memref<1x128xf32, #tpu.memory_space<vmem>>, %arg10: memref<10x128xf32, #tpu.memory_space<vmem>>) attributes {dimension_semantics = [#tpu.dimension_semantics<parallel>], iteration_bounds = array<i64: 1>, scalar_prefetch = 0 : i64, scratch_operands = 0 : i64, tpu.core_type = #tpu.core_type<tc>, window_params = [{transform_indices = @transform_0, window_bounds = array<i64: 10, 32>}, {pipeline_mode = #tpu.pipeline_mode<synchronous>, transform_indices = @transform_1, window_bounds = array<i64: 32, 128>}, {pipeline_mode = #tpu.pipeline_mode<synchronous>, transform_indices = @transform_2, window_bounds = array<i64: 1, 128>}, {pipeline_mode = #tpu.pipeline_mode<synchronous>, transform_indices = @transform_3, window_bounds = array<i64: 128, 128>}, {pipeline_mode = #tpu.pipeline_mode<synchronous>, transform_indices = @transform_4, window_bounds = array<i64: 1, 128>}, {pipeline_mode = #tpu.pipeline_mode<synchronous>, transform_indices = @transform_5, window_bounds = array<i64: 128, 128>}, {pipeline_mode = #tpu.pipeline_mode<synchronous>, transform_indices = @transform_6, window_bounds = array<i64: 1, 128>}, {pipeline_mode = #tpu.pipeline_mode<synchronous>, transform_indices = @transform_7, window_bounds = array<i64: 32, 128>}, {pipeline_mode = #tpu.pipeline_mode<synchronous>, transform_indices = @transform_8, window_bounds = array<i64: 1, 128>}, {transform_indices = @transform_9, window_bounds = array<i64: 10, 128>}]} {
    %c0 = arith.constant 0 : index
    %c0_0 = arith.constant 0 : index
    %0 = vector.load %arg1[%c0, %c0_0] : memref<10x32xf32, #tpu.memory_space<vmem>>, vector<10x32xf32>
    %c0_1 = arith.constant 0 : index
    %c0_2 = arith.constant 0 : index
    %1 = vector.load %arg2[%c0_1, %c0_2] : memref<32x128xf32, #tpu.memory_space<vmem>>, vector<32x128xf32>
    %c0_3 = arith.constant 0 : index
    %c0_4 = arith.constant 0 : index
    %2 = vector.load %arg3[%c0_3, %c0_4] : memref<1x128xf32, #tpu.memory_space<vmem>>, vector<1x128xf32>
    %cst = arith.constant dense<0.000000e+00> : vector<10x128xf32>
    %3 = tpu.matmul %0, %1, %cst {dimension_numbers = #tpu.dot_dimension_numbers<[1], [0], [0], [1], [0, 0, 1, 1], [], []>, precision = #tpu.contract_precision<fp32>} : vector<10x32xf32>, vector<32x128xf32>, vector<10x128xf32> -> vector<10x128xf32>
    %4 = vector.broadcast %2 : vector<1x128xf32> to vector<10x128xf32>
    %5 = arith.addf %3, %4 : vector<10x128xf32>
    %cst_5 = arith.constant 0.000000e+00 : f32
    %6 = vector.broadcast %cst_5 : f32 to vector<10x128xf32>
    %7 = arith.maximumf %5, %6 : vector<10x128xf32>
    %c0_6 = arith.constant 0 : index
    %c0_7 = arith.constant 0 : index
    %8 = vector.load %arg4[%c0_6, %c0_7] : memref<128x128xf32, #tpu.memory_space<vmem>>, vector<128x128xf32>
    %c0_8 = arith.constant 0 : index
    %c0_9 = arith.constant 0 : index
    %9 = vector.load %arg5[%c0_8, %c0_9] : memref<1x128xf32, #tpu.memory_space<vmem>>, vector<1x128xf32>
    %cst_10 = arith.constant dense<0.000000e+00> : vector<10x128xf32>
    %10 = tpu.matmul %7, %8, %cst_10 {dimension_numbers = #tpu.dot_dimension_numbers<[1], [0], [0], [1], [0, 0, 1, 1], [], []>, precision = #tpu.contract_precision<fp32>} : vector<10x128xf32>, vector<128x128xf32>, vector<10x128xf32> -> vector<10x128xf32>
    %11 = vector.broadcast %9 : vector<1x128xf32> to vector<10x128xf32>
    %12 = arith.addf %10, %11 : vector<10x128xf32>
    %cst_11 = arith.constant 0.000000e+00 : f32
    %13 = vector.broadcast %cst_11 : f32 to vector<10x128xf32>
    %14 = arith.maximumf %12, %13 : vector<10x128xf32>
    %c0_12 = arith.constant 0 : index
    %c0_13 = arith.constant 0 : index
    %15 = vector.load %arg6[%c0_12, %c0_13] : memref<128x128xf32, #tpu.memory_space<vmem>>, vector<128x128xf32>
    %c0_14 = arith.constant 0 : index
    %c0_15 = arith.constant 0 : index
    %16 = vector.load %arg7[%c0_14, %c0_15] : memref<1x128xf32, #tpu.memory_space<vmem>>, vector<1x128xf32>
    %cst_16 = arith.constant dense<0.000000e+00> : vector<10x128xf32>
    %17 = tpu.matmul %14, %15, %cst_16 {dimension_numbers = #tpu.dot_dimension_numbers<[1], [0], [0], [1], [0, 0, 1, 1], [], []>, precision = #tpu.contract_precision<fp32>} : vector<10x128xf32>, vector<128x128xf32>, vector<10x128xf32> -> vector<10x128xf32>
    %18 = vector.broadcast %16 : vector<1x128xf32> to vector<10x128xf32>
    %19 = arith.addf %17, %18 : vector<10x128xf32>
    %c0_17 = arith.constant 0 : index
    %c0_18 = arith.constant 0 : index
    %20 = vector.load %arg8[%c0_17, %c0_18] : memref<32x128xf32, #tpu.memory_space<vmem>>, vector<32x128xf32>
    %c0_19 = arith.constant 0 : index
    %c0_20 = arith.constant 0 : index
    %21 = vector.load %arg9[%c0_19, %c0_20] : memref<1x128xf32, #tpu.memory_space<vmem>>, vector<1x128xf32>
    %cst_21 = arith.constant dense<0.000000e+00> : vector<10x128xf32>
    %22 = tpu.matmul %0, %20, %cst_21 {dimension_numbers = #tpu.dot_dimension_numbers<[1], [0], [0], [1], [0, 0, 1, 1], [], []>, precision = #tpu.contract_precision<fp32>} : vector<10x32xf32>, vector<32x128xf32>, vector<10x128xf32> -> vector<10x128xf32>
    %23 = arith.addf %19, %22 : vector<10x128xf32>
    %24 = vector.broadcast %21 : vector<1x128xf32> to vector<10x128xf32>
    %25 = arith.addf %23, %24 : vector<10x128xf32>
    %c0_22 = arith.constant 0 : index
    %c0_23 = arith.constant 0 : index
    %26 = vector.load %arg10[%c0_22, %c0_23] : memref<10x128xf32, #tpu.memory_space<vmem>>, vector<10x128xf32>
    tpu.vector_store %arg10[%c0_22, %c0_23], %25 {strides = array<i32>} : memref<10x128xf32, #tpu.memory_space<vmem>>, vector<10x128xf32>,
    return
  }
  func.func @transform_0(%arg0: i32) -> (i32, i32) {
    %c0_i32 = arith.constant 0 : i32
    %c0_i32_0 = arith.constant 0 : i32
    return %arg0, %c0_i32 : i32, i32
  }
  func.func @transform_1(%arg0: i32) -> (i32, i32) {
    %c0_i32 = arith.constant 0 : i32
    %c0_i32_0 = arith.constant 0 : i32
    %c0_i32_1 = arith.constant 0 : i32
    return %c0_i32, %c0_i32_0 : i32, i32
  }
  func.func @transform_2(%arg0: i32) -> (i32, i32) {
    %c0_i32 = arith.constant 0 : i32
    %c0_i32_0 = arith.constant 0 : i32
    %c0_i32_1 = arith.constant 0 : i32
    return %c0_i32, %c0_i32_0 : i32, i32
  }
  func.func @transform_3(%arg0: i32) -> (i32, i32) {
    %c0_i32 = arith.constant 0 : i32
    %c0_i32_0 = arith.constant 0 : i32
    %c0_i32_1 = arith.constant 0 : i32
    return %c0_i32, %c0_i32_0 : i32, i32
  }
  func.func @transform_4(%arg0: i32) -> (i32, i32) {
    %c0_i32 = arith.constant 0 : i32
    %c0_i32_0 = arith.constant 0 : i32
    %c0_i32_1 = arith.constant 0 : i32
    return %c0_i32, %c0_i32_0 : i32, i32
  }
  func.func @transform_5(%arg0: i32) -> (i32, i32) {
    %c0_i32 = arith.constant 0 : i32
    %c0_i32_0 = arith.constant 0 : i32
    %c0_i32_1 = arith.constant 0 : i32
    return %c0_i32, %c0_i32_0 : i32, i32
  }
  func.func @transform_6(%arg0: i32) -> (i32, i32) {
    %c0_i32 = arith.constant 0 : i32
    %c0_i32_0 = arith.constant 0 : i32
    %c0_i32_1 = arith.constant 0 : i32
    return %c0_i32, %c0_i32_0 : i32, i32
  }
  func.func @transform_7(%arg0: i32) -> (i32, i32) {
    %c0_i32 = arith.constant 0 : i32
    %c0_i32_0 = arith.constant 0 : i32
    %c0_i32_1 = arith.constant 0 : i32
    return %c0_i32, %c0_i32_0 : i32, i32
  }
  func.func @transform_8(%arg0: i32) -> (i32, i32) {
    %c0_i32 = arith.constant 0 : i32
    %c0_i32_0 = arith.constant 0 : i32
    %c0_i32_1 = arith.constant 0 : i32
    return %c0_i32, %c0_i32_0 : i32, i32
  }
  func.func @transform_9(%arg0: i32) -> (i32, i32) {
    %c0_i32 = arith.constant 0 : i32
    %c0_i32_0 = arith.constant 0 : i32
    return %arg0, %c0_i32 : i32, i32
  }
}

</mosaic_0001>

<bundles_post_ra>
// kernel: tpu_custom_call.1
= control target key start
LH: loop header
LB: loop body
LE: loop exit
PB: predicated region body
PF: predicated region fallthrough
CT: control target
= control target key end

     0   :  { %14 = vsyncpa [#allocation3], 0  ;;  %s4930_s0 = inlined_call_operand.hbm [shape: f32[10,32], index: 0, kind: input, shape index: {}]   ;;  %s4931_s1 = inlined_call_operand.hbm [shape: f32[32,128], index: 1, kind: input, shape index: {}]   ;;  %s4932_s2 = inlined_call_operand.vmem [shape: f32[1,128], index: 2, kind: input, shape index: {}]   ;;  %s4933_s3 = inlined_call_operand.hbm [shape: f32[128,128], index: 3, kind: input, shape index: {}]   ;;  %s4934_s4 = inlined_call_operand.vmem [shape: f32[1,128], index: 4, kind: input, shape index: {}]   ;;  %s4935_s5 = inlined_call_operand.hbm [shape: f32[128,128], index: 5, kind: input, shape index: {}]   ;;  %s4936_s6 = inlined_call_operand.vmem [shape: f32[1,128], index: 6, kind: input, shape index: {}]   ;;  %s4937_s7 = inlined_call_operand.hbm [shape: f32[32,128], index: 7, kind: input, shape index: {}]   ;;  %s4938_s8 = inlined_call_operand.vmem [shape: f32[1,128], index: 8, kind: input, shape index: {}]   ;;  %s4939_s9 = inlined_call_operand.hbm [shape: f32[10,128], index: 9, kind: output, shape index: {}]  }
   0x1   :  { %15 = vsyncpa [#allocation6], 0 }
   0x2   :  { %16 = vsyncpa [#allocation9], 0 }
   0x3   :  { %17 = vsyncpa [#allocation4], 0  ;;  %s4151_s30 = smov [#allocation5]   ;;  %s4152_s11 = smov [#allocation8]  }
   0x4   :  { %s35_s10 = sshll.u32 %s4151_s30, 4  ;;  %s63_s12 = sshll.u32 %s4152_s11, 4  ;;  %s36_s10 = int_to_ptr.vmem [resolvable:$true] %s35_s10  ;;  %s4209_s12 = int_to_ptr.vmem [resolvable:$true] %s63_s12 }
   0x5   :  { %s4011_s15 = scalar_lea.hbm %s4931_s1, 512 }
   0x6   :  { %p4012_p0 = scmp.ne.s32.totalorder %s4931_s1, %s4011_s15  ;;  %p4015_p1 = scmp.lt.u32.totalorder %s4011_s15, %s4931_s1 }
   0x8   :  { %p4017_p2 = pnand %p4015_p1, %p4012_p0 }
   0xa   :  { %4020 = shalt.err (!%p4017_p2)
}
   0xb   :  { %s4021_s20 = scalar_lea.vmem %s36_s10, 512  ;;  %p4026_p4 = scmp.lt.s32.totalorder %s36_s10, %s36_s10 }
   0xc   :  { %p4022_p3 = scmp.ne.s32.totalorder %s36_s10, %s4021_s20  ;;  %p4027_p5 = scmp.lt.s32.totalorder %s4021_s20, %s4021_s20 }
   0xe   :  { %p4028_p6 = por %p4027_p5, %p4026_p4 }
  0x10   :  { %p4029_p7 = pnand %p4028_p6, %p4022_p3 }
  0x12   :  { %4032 = shalt.err (!%p4029_p7)
}
  0x13   :  { %s4153_s21 = smov 128   ;;  %s4154_s22 = smov 8  }
  0x14   :  { %41 = dma.hbm_to_vmem [thread:$0]  %s4931_s1, 512, %s36_s10, [#allocation6], %s4153_s21, %s4153_s21, %s4154_s22  }
  0x15   :  { %s4033_s27 = scalar_lea.hbm %s4935_s5, 2048 }
  0x16   :  { %p4034_p8 = scmp.ne.s32.totalorder %s4935_s5, %s4033_s27  ;;  %p4037_p9 = scmp.lt.u32.totalorder %s4033_s27, %s4935_s5 }
  0x18   :  { %p4039_p10 = pnand %p4037_p9, %p4034_p8 }
  0x1a   :  { %4042 = shalt.err (!%p4039_p10)
}
  0x1b   :  { %s4043_s13 = scalar_lea.vmem %s4209_s12, 2048  ;;  %p4048_p12 = scmp.lt.s32.totalorder %s4209_s12, %s4209_s12 }
  0x1c   :  { %p4044_p11 = scmp.ne.s32.totalorder %s4209_s12, %s4043_s13  ;;  %p4049_p13 = scmp.lt.s32.totalorder %s4043_s13, %s4043_s13 }
  0x1e   :  { %p4050_p0 = por %p4049_p13, %p4048_p12 }
  0x20   :  { %p4051_p1 = pnand %p4050_p0, %p4044_p11 }
  0x22   :  { %4054 = shalt.err (!%p4051_p1)
}
  0x23   :  { %69 = dma.hbm_to_vmem [thread:$0]  %s4935_s5, 2048, %s4209_s12, [#allocation9], %s4153_s21, %s4153_s21, %s4154_s22  }
  0x24   :  { %s4155_s14 = smov [#allocation2]   ;;  %s4156_s16 = smov [#allocation7]  }
  0x25   :  { %s23_s15 = sshll.u32 %s4155_s14, 4  ;;  %s49_s17 = sshll.u32 %s4156_s16, 4  ;;  %s24_s15 = int_to_ptr.vmem [resolvable:$true] %s23_s15  ;;  %s4246_s17 = int_to_ptr.vmem [resolvable:$true] %s49_s17 }
  0x26   :  { %s4055_s20 = scalar_lea.hbm %s4930_s0, 256 }
  0x27   :  { %p4056_p2 = scmp.ne.s32.totalorder %s4930_s0, %s4055_s20  ;;  %p4059_p3 = scmp.lt.u32.totalorder %s4055_s20, %s4930_s0 }
  0x29   :  { %p4061_p4 = pnand %p4059_p3, %p4056_p2 }
  0x2b   :  { %4064 = shalt.err (!%p4061_p4)
}
  0x2c   :  { %s4065_s5 = scalar_lea.vmem %s24_s15, 256  ;;  %p4070_p6 = scmp.lt.s32.totalorder %s24_s15, %s24_s15 }
  0x2d   :  { %p4066_p5 = scmp.ne.s32.totalorder %s24_s15, %s4065_s5  ;;  %p4071_p7 = scmp.lt.s32.totalorder %s4065_s5, %s4065_s5 }
  0x2f   :  { %p4072_p8 = por %p4071_p7, %p4070_p6 }
  0x31   :  { %p4073_p9 = pnand %p4072_p8, %p4066_p5 }
  0x33   :  { %4076 = shalt.err (!%p4073_p9)
}
  0x34   :  { %29 = dma.hbm_to_vmem [thread:$0]  %s4930_s0, 256, %s24_s15, [#allocation3], %s4153_s21, %s4153_s21, %s4154_s22  }
  0x35   :  { %s4077_s30 = scalar_lea.hbm %s4933_s3, 2048 }
  0x36   :  { %p4078_p10 = scmp.ne.s32.totalorder %s4933_s3, %s4077_s30  ;;  %p4081_p11 = scmp.lt.u32.totalorder %s4077_s30, %s4933_s3 }
  0x38   :  { %p4083_p12 = pnand %p4081_p11, %p4078_p10 }
  0x3a   :  { %4086 = shalt.err (!%p4083_p12)
}
  0x3b   :  { %s4087_s14 = scalar_lea.vmem %s4246_s17, 2048  ;;  %p4092_p0 = scmp.lt.s32.totalorder %s4246_s17, %s4246_s17 }
  0x3c   :  { %p4088_p13 = scmp.ne.s32.totalorder %s4246_s17, %s4087_s14  ;;  %p4093_p1 = scmp.lt.s32.totalorder %s4087_s14, %s4087_s14 }
  0x3e   :  { %p4094_p2 = por %p4093_p1, %p4092_p0 }
  0x40   :  { %p4095_p3 = pnand %p4094_p2, %p4088_p13 }
  0x42   :  { %4098 = shalt.err (!%p4095_p3)
}
  0x43   :  { %55 = dma.hbm_to_vmem [thread:$0]  %s4933_s3, 2048, %s4246_s17, [#allocation6], %s4153_s21, %s4153_s21, %s4154_s22  }
  0x44   :  { %s4157_s16 = smov [#allocation10]   ;;  %s4099_s23 = scalar_lea.hbm %s4937_s7, 512 }
  0x45   :  { %s77_s18 = sshll.u32 %s4157_s16, 4  ;;  %p4100_p4 = scmp.ne.s32.totalorder %s4937_s7, %s4099_s23  ;;  %s78_s18 = int_to_ptr.vmem [resolvable:$true] %s77_s18 }
  0x46   :  { %p4103_p5 = scmp.lt.u32.totalorder %s4099_s23, %s4937_s7 }
  0x48   :  { %p4105_p6 = pnand %p4103_p5, %p4100_p4 }
  0x4a   :  { %4108 = shalt.err (!%p4105_p6)
}
  0x4b   :  { %s4109_s12 = scalar_lea.vmem %s78_s18, 512  ;;  %p4114_p8 = scmp.lt.s32.totalorder %s78_s18, %s78_s18 }
  0x4c   :  { %p4110_p7 = scmp.ne.s32.totalorder %s78_s18, %s4109_s12  ;;  %p4115_p9 = scmp.lt.s32.totalorder %s4109_s12, %s4109_s12 }
  0x4e   :  { %p4116_p10 = por %p4115_p9, %p4114_p8 }
  0x50   :  { %p4117_p11 = pnand %p4116_p10, %p4110_p7 }
  0x52   :  { %4120 = shalt.err (!%p4117_p11)
}
  0x53   :  { %83 = dma.hbm_to_vmem [thread:$0]  %s4937_s7, 512, %s78_s18, [#allocation9], %s4153_s21, %s4153_s21, %s4154_s22  }
  0x54   :  { %4143 = dma.done.wait [#allocation3], 256  }
  0x55   :  { %4144 = vsyncadd [#allocation3], 4294967040 }
  0x56   :  { %4145 = dma.done.wait [#allocation6], 2560  }
  0x57   :  { %4146 = vsyncadd [#allocation6], 4294964736 }
  0x58   :  { %4147 = dma.done.wait [#allocation9], 2560  }
  0x59   :  { %4148 = vsyncadd [#allocation9], 4294964736  ;;  %vm114_vm0 = vcmask 261120   ;;  %v103_v0 = vld [vmem:[#allocation5] sm:$0xff]  ;;  %v104_v1 = vld [vmem:[#allocation5 + $0x8] sm:$0xff]  ;;  %s4158_s13 = smov [#allocation11]  }
  0x5a   :  { %v105_v2 = vld [vmem:[#allocation5 + $0x10] sm:$0xff]  ;;  %v122_v3 = vand.u32 4294901760, %v103_v0  ;;  %v125_v4 = vand.u32 4294901760, %v104_v1  ;;  %v106_v5 = vld [vmem:[#allocation5 + $0x18] sm:$0xff]  ;;  %v4332_v39 = vld [vmem:[#allocation7] sm:$0xff]  ;;  %s2617_s1 = sshll.u32 %s4158_s13, 4  ;;  %s2618_s1 = int_to_ptr.vmem [resolvable:$true] %s2617_s1 }
  0x5b   :  { %v128_v6 = vand.u32 4294901760, %v105_v2  ;;  %v101_v7 = vld [vmem:[#allocation2] sm:$0xff]  ;;  %v131_v8 = vand.u32 4294901760, %v106_v5  ;;  %v102_v10 = vld [vmem:[#allocation2 + $0x8] sm:$0x3]  ;;  %v4334_v40 = vld [vmem:[#allocation7 + $0x8] sm:$0xff]  ;;  %p4126_p13 = scmp.lt.s32.totalorder %s2618_s1, %s2618_s1 }
  0x5c   :  { %v116_v9 = vsel %vm114_vm0, %v101_v7, 0  ;;  %v4299_v11 = vpack.c.bf16 %v125_v4, %v122_v3  ;;  %v212_v12 = vsub.f32 %v103_v0, %v122_v3  ;;  %v219_v13 = vsub.f32 %v104_v1, %v125_v4  ;;  %v4348_v48 = vld [vmem:[#allocation7 + $0x10] sm:$0xff]  ;;  %v4350_v49 = vld [vmem:[#allocation7 + $0x18] sm:$0xff]  ;;  %v655_v56 = vld [vmem:[#allocation7 + $0x20] sm:$0xff]  ;;  %s4121_s10 = scalar_lea.vmem %s2618_s1, 256 }
  0x5d   :  { %v4301_v14 = vsub.f32 %v105_v2, %v128_v6  ;;  %v4303_v15 = vpack.c.bf16 %v131_v8, %v128_v6  ;;  %v233_v16 = vsub.f32 %v106_v5, %v131_v8  ;;  %v4305_v17 = vand.u32 4294901760, %v116_v9  ;;  %v656_v57 = vld [vmem:[#allocation7 + $0x28] sm:$0xff]  ;;  %v657_v58 = vld [vmem:[#allocation7 + $0x30] sm:$0xff]  ;;  %v658_v61 = vld [vmem:[#allocation7 + $0x38] sm:$0xff]  ;;  %p4122_p12 = scmp.ne.s32.totalorder %s2618_s1, %s4121_s10  ;;  %p4127_p0 = scmp.lt.s32.totalorder %s4121_s10, %s4121_s10 }
  0x5e   :  { %v119_v18 = vsel %vm114_vm0, %v102_v10, 0  ;;  %v3491_v19 = vpack.c.bf16 %v219_v13, %v212_v12  ;;  %3476 = vmatprep.subr.bf16.mxu1 %v4299_v11  ;;  %v213_v21 = vand.u32 4294901760, %v212_v12  ;;  %v220_v22 = vand.u32 4294901760, %v219_v13  ;;  %v659_v2 = vld [vmem:[#allocation7 + $0x40] sm:$0xff]  ;;  %v660_v3 = vld [vmem:[#allocation7 + $0x48] sm:$0xff]  ;;  %v661_v7 = vld [vmem:[#allocation7 + $0x50] sm:$0xff] }
  0x5f   :  { %4982 = vst [vmem:[#allocation16_spill] sm:$0xff] %v4305_v17  ;;  %v4309_v20 = vand.u32 4294901760, %v119_v18  ;;  %v3495_v23 = vpack.c.bf16 %v233_v16, %v4301_v14  ;;  %3478 = vmatpush3.bf16.msra.mxu1 %v4299_v11  ;;  %v4314_v24 = vsub.f32 %v116_v9, %v4305_v17  ;;  %v227_v25 = vand.u32 4294901760, %v4301_v14  ;;  %v662_v8 = vld [vmem:[#allocation7 + $0x58] sm:$0xff]  ;;  %p4128_p1 = por %p4127_p0, %p4126_p13 }
  0x60   :  { %v234_v26 = vand.u32 4294901760, %v233_v16  ;;  %3492 = vmatprep.subr.bf16.mxu0 %v3491_v19  ;;  %3480 = vmatprep.subr.bf16.mxu1 %v4303_v15  ;;  %v214_v28 = vsub.f32 %v212_v12, %v213_v21  ;;  %v221_v29 = vsub.f32 %v219_v13, %v220_v22  ;;  %v675_v45 = vand.u32 4294901760, %v4332_v39  ;;  %v663_v12 = vld [vmem:[#allocation7 + $0x60] sm:$0xff]  ;;  %v664_v13 = vld [vmem:[#allocation7 + $0x68] sm:$0xff] }
  0x61   :  { %4983 = vst [vmem:[#allocation17_spill] sm:$0xff] %v4309_v20  ;;  %4984 = vst [vmem:[#allocation18_spill] sm:$0xff] %v4314_v24  ;;  %v4318_v27 = vsub.f32 %v119_v18, %v4309_v20  ;;  %3494 = vmatpush3.bf16.msra.mxu0 %v3491_v19  ;;  %2953 = vmatprep.mubr.f32.mxu0 %v4314_v24  ;;  %v4323_v30 = vand.u32 4294901760, %v4314_v24  ;;  %v228_v31 = vsub.f32 %v4301_v14, %v227_v25  ;;  %p4129_p2 = pnand %p4128_p1, %p4122_p12 }
  0x62   :  { %v235_v32 = vsub.f32 %v233_v16, %v234_v26  ;;  %3496 = vmatprep.subr.bf16.mxu0 %v3495_v23  ;;  %v215_v34 = vand.u32 4294901760, %v214_v28  ;;  %v222_v35 = vand.u32 4294901760, %v221_v29  ;;  %v678_v46 = vand.u32 4294901760, %v4334_v40 }
  0x63   :  { %4985 = vst [vmem:[#allocation19_spill] sm:$0xff] %v4318_v27  ;;  %4986 = vst [vmem:[#allocation20_spill] sm:$0xff] %v4323_v30  ;;  %v4327_v33 = vand.u32 4294901760, %v4318_v27  ;;  %3482 = vmatpush3.bf16.msra.mxu1 %v4303_v15  ;;  %v193_v36 = vsub.f32 %v4314_v24, %v4323_v30  ;;  %v229_v37 = vand.u32 4294901760, %v228_v31  ;;  %v3507_v50 = vpack.c.bf16 %v220_v22, %v213_v21  ;;  %v665_v21 = vld [vmem:[#allocation7 + $0x70] sm:$0xff]  ;;  %v666_v22 = vld [vmem:[#allocation7 + $0x78] sm:$0xff] }
  0x64   :  { %v236_v38 = vand.u32 4294901760, %v235_v32  ;;  %v3483_v42 = vpack.c.bf16 %v222_v35, %v215_v34  ;;  %v4359_v51 = vpack.c.bf16 %v678_v46, %v675_v45  ;;  %v681_v52 = vand.u32 4294901760, %v4348_v48  ;;  %v1368_v24 = vld [vmem:[#allocation8 + $0x40] sm:$0xff] }
  0x65   :  { %4987 = vst [vmem:[#allocation21_spill] sm:$0xff] %v4327_v33  ;;  %v203_v41 = vsub.f32 %v4318_v27, %v4327_v33  ;;  %3498 = vmatpush3.bf16.msra.mxu0 %v3495_v23  ;;  %v4338_v43 = vand.u32 4294901760, %v193_v36  ;;  %v684_v53 = vand.u32 4294901760, %v4350_v49  ;;  %v3511_v54 = vpack.c.bf16 %v234_v26, %v227_v25 }
  0x66   :  { %3500 = vmatprep.subr.bf16.mxu0 %v4299_v11  ;;  %3484 = vmatprep.subr.bf16.mxu1 %v3483_v42  ;;  %v3487_v47 = vpack.c.bf16 %v236_v38, %v229_v37  ;;  %v687_v59 = vand.u32 4294901760, %v655_v56  ;;  %v690_v60 = vand.u32 4294901760, %v656_v57  ;;  %v693_v62 = vand.u32 4294901760, %v657_v58 }
  0x67   :  { %4988 = vst [vmem:[#allocation22_spill] sm:$0xff] %v4338_v43  ;;  %v4341_v44 = vand.u32 4294901760, %v203_v41  ;;  %2931 = vmatprep.mubr.f32.mxu1 %v4338_v43  ;;  %v4370_v55 = vpack.c.bf16 %v684_v53, %v681_v52  ;;  %v696_v63 = vand.u32 4294901760, %v658_v61  ;;  %v699_v4 = vand.u32 4294901760, %v659_v2 }
  0x68   :  { %2954 = vmatmul.mubr.f32.vlgmr.msra.gmra.mrb[0].mxu0 %v4318_v27  ;;  %v4385_v0 = vpack.c.bf16 %v690_v60, %v687_v59  ;;  %v702_v5 = vand.u32 4294901760, %v660_v3  ;;  %v705_v9 = vand.u32 4294901760, %v661_v7  ;;  %v708_v10 = vand.u32 4294901760, %v662_v8 }
  0x69   :  { %4989 = vst [vmem:[#allocation23_spill] sm:$0xff] %v4341_v44  ;;  %2932 = vmatmul.mubr.f32.vlgmr.msra.gmra.mrb[0].mxu1 %v4341_v44  ;;  %3502 = vmatpush3.bf16.msra.mxu0 %v4299_v11  ;;  %v4387_v1 = vpack.c.bf16 %v696_v63, %v693_v62  ;;  %v711_v14 = vand.u32 4294901760, %v663_v12  ;;  %v4406_v18 = vsub.f32 %v4332_v39, %v675_v45  ;;  %v717_v23 = vand.u32 4294901760, %v665_v21 }
  0x6a   :  { %3486 = vmatpush3.bf16.msra.mxu1 %v3483_v42  ;;  %3504 = vmatprep.subr.bf16.mxu0 %v4303_v15  ;;  %v4393_v6 = vpack.c.bf16 %v702_v5, %v699_v4  ;;  %v4411_v19 = vsub.f32 %v4334_v40, %v678_v46  ;;  %v720_v25 = vand.u32 4294901760, %v666_v22  ;;  %v4429_v37 = vsub.f32 %v655_v56, %v687_v59 }
  0x6b   :  { %2964 = vmatprep.mubr.f32.mxu0 %v4323_v30  ;;  %3488 = vmatprep.subr.bf16.mxu1 %v3487_v47  ;;  %v4956_v26 = vand.u32 4294901760, %v4406_v18  ;;  %v4431_v38 = vsub.f32 %v656_v57, %v690_v60  ;;  %v4442_v45 = vsub.f32 %v657_v58, %v693_v62  ;;  %v4444_v46 = vsub.f32 %v658_v61, %v696_v63 }
  0x6c   :  { %2942 = vmatprep.mubr.f32.mxu1 %v4305_v17  ;;  %v4952_v28 = vand.u32 4294901760, %v4411_v19  ;;  %v4417_v29 = vpack.c.bf16 %v720_v25, %v717_v23  ;;  %v4951_v39 = vand.u32 4294901760, %v4429_v37  ;;  %v4453_v60 = vsub.f32 %v659_v2, %v699_v4 }
  0x6d   :  { %3506 = vmatpush3.bf16.msra.mxu0 %v4303_v15  ;;  %v779_v31 = vsub.f32 %v4406_v18, %v4956_v26  ;;  %v4950_v40 = vand.u32 4294901760, %v4431_v38  ;;  %v4948_v56 = vand.u32 4294901760, %v4444_v46  ;;  %v4470_v4 = vsub.f32 %v662_v8, %v708_v10 }
  0x6e   :  { %3490 = vmatpush3.bf16.msra.mxu1 %v3487_v47  ;;  %3508 = vmatprep.subr.bf16.mxu0 %v3507_v50  ;;  %v786_v32 = vsub.f32 %v4411_v19, %v4952_v28  ;;  %v807_v41 = vsub.f32 %v4429_v37, %v4951_v39  ;;  %v4947_v62 = vand.u32 4294901760, %v4453_v60  ;;  %v4484_v8 = vsub.f32 %v663_v12, %v711_v14 }
  0x6f   :  { %3524 = vmatprep.subr.bf16.mxu1 %v4359_v51  ;;  %v780_v34 = vand.u32 4294901760, %v779_v31  ;;  %v814_v42 = vsub.f32 %v4431_v38, %v4950_v40  ;;  %v4455_v31 = vsub.f32 %v660_v3, %v702_v5  ;;  %v828_v58 = vsub.f32 %v4444_v46, %v4948_v56 }
  0x70   :  { %2965 = vmatmul.mubr.f32.vlgmr.msra.gmra.mrb[0].mxu0 %v4327_v33  ;;  %v787_v35 = vand.u32 4294901760, %v786_v32  ;;  %v808_v47 = vand.u32 4294901760, %v807_v41  ;;  %v4468_v3 = vsub.f32 %v661_v7, %v705_v9 }
  0x71   :  { %2943 = vmatmul.mubr.f32.vlgmr.msra.gmra.mrb[0].mxu1 %v4309_v20  ;;  %3510 = vmatpush3.bf16.msra.mxu0 %v3507_v50  ;;  %v815_v50 = vand.u32 4294901760, %v814_v42  ;;  %v4946_v63 = vand.u32 4294901760, %v4455_v31  ;;  %v829_v32 = vand.u32 4294901760, %v828_v58 }
  0x72   :  { %2975 = vmatprep.mubr.f32.mxu0 %v4305_v17  ;;  %3512 = vmatprep.subr.bf16.mxu0 %v3511_v54  ;;  %v4427_v36 = vpack.c.bf16 %v787_v35, %v780_v34  ;;  %v835_v34 = vsub.f32 %v4453_v60, %v4947_v62  ;;  %v4945_v42 = vand.u32 4294901760, %v4468_v3 }
  0x73   :  { %3526 = vmatpush3.bf16.msra.mxu1 %v4359_v51  ;;  %v4448_v57 = vpack.c.bf16 %v815_v50, %v808_v47  ;;  %v842_v2 = vsub.f32 %v4455_v31, %v4946_v63  ;;  %v4944_v47 = vand.u32 4294901760, %v4470_v4 }
  0x74   :  { %3528 = vmatprep.subr.bf16.mxu1 %v4370_v55  ;;  %v836_v35 = vand.u32 4294901760, %v835_v34 }
  0x75   :  { %3514 = vmatpush3.bf16.msra.mxu0 %v3511_v54  ;;  %v4949_v54 = vand.u32 4294901760, %v4442_v45  ;;  %v843_v41 = vand.u32 4294901760, %v842_v2  ;;  %v856_v7 = vsub.f32 %v4470_v4, %v4944_v47 }
  0x76   :  { %3516 = vmatprep.subr.bf16.mxu0 %v4299_v11 }
  0x77   :  { %3530 = vmatpush3.bf16.msra.mxu1 %v4370_v55  ;;  %v821_v59 = vsub.f32 %v4442_v45, %v4949_v54  ;;  %v4476_v50 = vpack.c.bf16 %v843_v41, %v836_v35  ;;  %v857_v58 = vand.u32 4294901760, %v856_v7  ;;  %v4495_v35 = vsub.f32 %v665_v21, %v717_v23 }
  0x78   :  { %2976 = vmatmul.mubr.f32.vlgmr.msra.gmra.mrb[0].mxu0 %v4309_v20  ;;  %3532 = vmatprep.subr.bf16.mxu1 %v4385_v0  ;;  %v4497_v41 = vsub.f32 %v666_v22, %v720_v25 }
  0x79   :  { %3518 = vmatpush3.bf16.msra.mxu0 %v4299_v11  ;;  %2986 = vmatprep.mubr.f32.mxu0 %v4305_v17  ;;  %v4397_v11 = vpack.c.bf16 %v708_v10, %v705_v9  ;;  %v822_v61 = vand.u32 4294901760, %v821_v59  ;;  %v849_v59 = vsub.f32 %v4468_v3, %v4945_v42 }
  0x7a   :  { %3520 = vmatprep.subr.bf16.mxu0 %v4303_v15 }
  0x7b   :  { %3534 = vmatpush3.bf16.msra.mxu1 %v4385_v0  ;;  %v4472_v5 = vpack.c.bf16 %v829_v32, %v822_v61  ;;  %v850_v10 = vand.u32 4294901760, %v849_v59  ;;  %v4943_v61 = vand.u32 4294901760, %v4484_v8 }
  0x7c   :  { %3536 = vmatprep.subr.bf16.mxu1 %v4387_v1 }
  0x7d   :  { %3522 = vmatpush3.bf16.msra.mxu0 %v4303_v15  ;;  %v714_v15 = vand.u32 4294901760, %v664_v13  ;;  %v4490_v34 = vpack.c.bf16 %v857_v58, %v850_v10  ;;  %v863_v2 = vsub.f32 %v4484_v8, %v4943_v61  ;;  %v3587_v58 = vpack.c.bf16 %v4411_v19, %v4406_v18 }
  0x7e   :  { %v4547_v61 = vsub.f32 %v4350_v49, %v684_v53 }
  0x7f   :  { %3538 = vmatpush3.bf16.msra.mxu1 %v4387_v1  ;;  %v4401_v16 = vpack.c.bf16 %v714_v15, %v711_v14  ;;  %v4486_v9 = vsub.f32 %v664_v13, %v714_v15  ;;  %v864_v13 = vand.u32 4294901760, %v863_v2  ;;  %v4940_v14 = vand.u32 4294901760, %v4495_v35 }
  0x80   :  { %2987 = vmatmul.mubr.f32.vlgmr.msra.gmra.mrb[0].mxu0 %v4309_v20  ;;  %3540 = vmatprep.subr.bf16.mxu1 %v4393_v6  ;;  %v4941_v15 = vand.u32 4294901760, %v4497_v41  ;;  %v4514_v2 = vpack.c.bf16 %v4431_v38, %v4429_v37 }
  0x81   :  { %v4942_v32 = vand.u32 4294901760, %v4486_v9  ;;  %v877_v7 = vsub.f32 %v4495_v35, %v4940_v14  ;;  %v4522_v14 = vpack.c.bf16 %v4455_v31, %v4453_v60 }
  0x82   :  { %v884_v21 = vsub.f32 %v4497_v41, %v4941_v15 }
  0x83   :  { %3542 = vmatpush3.bf16.msra.mxu1 %v4393_v6  ;;  %v870_v12 = vsub.f32 %v4486_v9, %v4942_v32  ;;  %v878_v23 = vand.u32 4294901760, %v877_v7  ;;  %v4534_v7 = vpack.c.bf16 %v4497_v41, %v4495_v35  ;;  %v4542_v32 = vsub.f32 %v4348_v48, %v681_v52 }
  0x84   :  { %3544 = vmatprep.subr.bf16.mxu1 %v4397_v11  ;;  %v885_v25 = vand.u32 4294901760, %v884_v21 }
  0x85   :  { %v871_v59 = vand.u32 4294901760, %v870_v12  ;;  %v4518_v12 = vpack.c.bf16 %v4444_v46, %v4442_v45  ;;  %v4955_v40 = vand.u32 4294901760, %v4542_v32 }
  0x86   :  { %v3583_v10 = vpack.c.bf16 %v885_v25, %v878_v23  ;;  %v2631_v25 = vld [vmem:[%s4932_s2] ss:$0 sm:$0xff] }
  0x87   :  { %3546 = vmatpush3.bf16.msra.mxu1 %v4397_v11  ;;  %v3579_v22 = vpack.c.bf16 %v871_v59, %v864_v13  ;;  %v4526_v13 = vpack.c.bf16 %v4470_v4, %v4468_v3  ;;  %v4530_v59 = vpack.c.bf16 %v4486_v9, %v4484_v8  ;;  %v793_v49 = vsub.f32 %v4542_v32, %v4955_v40 }
  0x88   :  { %3548 = vmatprep.subr.bf16.mxu1 %v4401_v16 }
  0x8b   :  { %3550 = vmatpush3.bf16.msra.mxu1 %v4401_v16 }
  0x8c   :  { %3552 = vmatprep.subr.bf16.mxu1 %v4417_v29 }
  0x8f   :  { %3554 = vmatpush3.bf16.msra.mxu1 %v4417_v29 }
  0x90   :  { %3556 = vmatprep.subr.bf16.mxu1 %v4427_v36 }
 0x144   :  { %v2944_v21 = vpop.f32.mrb[0].mxu1 }
 0x145   :  { %v297_v23 = vpop.f32.mrb[1].mxu1  ;;  %v3955_v15 = vadd.f32 %v2944_v21, %v2631_v25  ;;  %v4953_v21 = vand.u32 4294901760, %v4547_v61 }
 0x146   :  { %v3957_v47 = vadd.f32 %v2631_v25, %v297_v23 }
 0x147   :  { %v800_v53 = vsub.f32 %v4547_v61, %v4953_v21 }
 0x153   :  { %v2988_v42 = vpop.f32.mrb[0].mxu0 }
 0x154   :  { %v3956_v63 = vadd.f32 %v3955_v15, %v2988_v42  ;;  %v639_v62 = vpop.f32.mrb[1].mxu0  ;;  %v794_v42 = vand.u32 4294901760, %v793_v49  ;;  %v1363_v49 = vld [vmem:[#allocation8 + $0x18] sm:$0xff] }
 0x155   :  { %v3958_v56 = vadd.f32 %v3957_v47, %v639_v62  ;;  %v801_v47 = vand.u32 4294901760, %v800_v53  ;;  %v1364_v53 = vld [vmem:[#allocation8 + $0x20] sm:$0xff] }
 0x156   :  { %v650_v54 = vmax.f32 %v3956_v63, 0.0 }
 0x157   :  { %v649_v39 = vmax.f32 %v3958_v56, 0.0  ;;  %v3559_v21 = vpack.c.bf16 %v801_v47, %v794_v42 }
 0x158   :  { %v4551_v28 = vand.u32 4294901760, %v650_v54 }
 0x159   :  { %v4553_v48 = vand.u32 4294901760, %v649_v39 }
 0x15a   :  { %v4556_v52 = vsub.f32 %v650_v54, %v4551_v28 }
 0x15b   :  { %v4565_v62 = vsub.f32 %v649_v39, %v4553_v48  ;;  %v1360_v39 = vld [vmem:[#allocation8] sm:$0xff] }
 0x15c   :  { %v4954_v56 = vand.u32 4294901760, %v4556_v52 }
 0x15d   :  { %v4957_v63 = vand.u32 4294901760, %v4565_v62 }
 0x15e   :  { %v768_v54 = vsub.f32 %v4556_v52, %v4954_v56  ;;  %v1367_v56 = vld [vmem:[#allocation8 + $0x38] sm:$0xff] }
 0x15f   :  { %v758_v15 = vsub.f32 %v4565_v62, %v4957_v63 }
 0x160   :  { %v769_v25 = vand.u32 4294901760, %v768_v54  ;;  %v1396_v54 = vand.u32 4294901760, %v1364_v53 }
 0x161   :  { %v759_v23 = vand.u32 4294901760, %v758_v15 }
 0x162   :  { %v4603_v33 = vsub.f32 %v1364_v53, %v1396_v54 }
 0x163   :  { %3021 = vmatprep.mubr.f32.mxu1 %v759_v23 }
 0x164   :  { %3022 = vmatmul.mubr.f32.vlgmr.msra.gmra.mrb[2].mxu1 %v769_v25  ;;  %4992 = vst [vmem:[#allocation26_spill] sm:$0xff] %v4603_v33 }
 0x165   :  { %3558 = vmatpush3.bf16.msra.mxu1 %v4427_v36  ;;  %3056 = vmatprep.mubr.f32.mxu1 %v4553_v48  ;;  %v3591_v36 = vpack.c.bf16 %v4547_v61, %v4542_v32 }
 0x166   :  { %3560 = vmatprep.subr.bf16.mxu1 %v3559_v21 }
 0x169   :  { %3562 = vmatpush3.bf16.msra.mxu1 %v3559_v21 }
 0x16a   :  { %3564 = vmatprep.subr.bf16.mxu1 %v4448_v57 }
 0x16d   :  { %3566 = vmatpush3.bf16.msra.mxu1 %v4448_v57  ;;  %v1361_v57 = vld [vmem:[#allocation8 + $0x8] sm:$0xff] }
 0x16e   :  { %3568 = vmatprep.subr.bf16.mxu1 %v4472_v5  ;;  %v1387_v21 = vand.u32 4294901760, %v1361_v57 }
 0x170   :  { %v4593_v23 = vsub.f32 %v1361_v57, %v1387_v21 }
 0x171   :  { %3570 = vmatpush3.bf16.msra.mxu1 %v4472_v5  ;;  %v1362_v5 = vld [vmem:[#allocation8 + $0x10] sm:$0xff] }
 0x172   :  { %3572 = vmatprep.subr.bf16.mxu1 %v4476_v50 }
 0x175   :  { %3574 = vmatpush3.bf16.msra.mxu1 %v4476_v50  ;;  %v1384_v50 = vand.u32 4294901760, %v1360_v39 }
 0x176   :  { %3576 = vmatprep.subr.bf16.mxu1 %v4490_v34 }
 0x177   :  { %v4589_v47 = vpack.c.bf16 %v1387_v21, %v1384_v50  ;;  %v4591_v15 = vsub.f32 %v1360_v39, %v1384_v50  ;;  %v4963_v39 = vand.u32 4294901760, %v4593_v23  ;;  %v4972_v21 = vand.u32 4294901760, %v4603_v33 }
 0x179   :  { %3578 = vmatpush3.bf16.msra.mxu1 %v4490_v34  ;;  %v1390_v34 = vand.u32 4294901760, %v1362_v5  ;;  %v4961_v30 = vand.u32 4294901760, %v4591_v15  ;;  %v1495_v53 = vsub.f32 %v4593_v23, %v4963_v39  ;;  %v1369_v39 = vld [vmem:[#allocation8 + $0x48] sm:$0xff] }
 0x17a   :  { %3580 = vmatprep.subr.bf16.mxu1 %v3579_v22 }
 0x17b   :  { %v4595_v25 = vsub.f32 %v1362_v5, %v1390_v34 }
 0x17d   :  { %3582 = vmatpush3.bf16.msra.mxu1 %v3579_v22  ;;  %v1365_v22 = vld [vmem:[#allocation8 + $0x28] sm:$0xff]  ;;  %4990 = vst [vmem:[#allocation24_spill] sm:$0xff] %v4595_v25  ;;  %v4966_v57 = vand.u32 4294901760, %v4595_v25 }
 0x17e   :  { %3584 = vmatprep.subr.bf16.mxu1 %v3583_v10  ;;  %v1399_v42 = vand.u32 4294901760, %v1365_v22 }
 0x180   :  { %v4601_v63 = vpack.c.bf16 %v1399_v42, %v1396_v54  ;;  %v4608_v50 = vsub.f32 %v1365_v22, %v1399_v42  ;;  %v1502_v22 = vsub.f32 %v4595_v25, %v4966_v57  ;;  %v1516_v42 = vsub.f32 %v4603_v33, %v4972_v21 }
 0x181   :  { %3586 = vmatpush3.bf16.msra.mxu1 %v3583_v10  ;;  %v1393_v10 = vand.u32 4294901760, %v1363_v49  ;;  %v1496_v57 = vand.u32 4294901760, %v1495_v53 }
 0x182   :  { %3588 = vmatprep.subr.bf16.mxu1 %v3587_v58  ;;  %4993 = vst [vmem:[#allocation27_spill] sm:$0xff] %v4608_v50  ;;  %v1503_v17 = vand.u32 4294901760, %v1502_v22  ;;  %v1517_v21 = vand.u32 4294901760, %v1516_v42 }
 0x183   :  { %v4597_v40 = vpack.c.bf16 %v1393_v10, %v1390_v34  ;;  %v4599_v26 = vsub.f32 %v1363_v49, %v1393_v10  ;;  %v1405_v34 = vand.u32 4294901760, %v1367_v56  ;;  %v4979_v10 = vand.u32 4294901760, %v4608_v50 }
 0x184   :  { %3057 = vmatmul.mubr.f32.vlgmr.msra.gmra.mrb[2].mxu1 %v4551_v28 }
 0x185   :  { %3590 = vmatpush3.bf16.msra.mxu1 %v3587_v58  ;;  %3091 = vmatprep.mubr.f32.mxu1 %v4565_v62  ;;  %v1366_v58 = vld [vmem:[#allocation8 + $0x30] sm:$0xff]  ;;  %4991 = vst [vmem:[#allocation25_spill] sm:$0xff] %v4599_v26  ;;  %v4970_v5 = vand.u32 4294901760, %v4599_v26  ;;  %v1523_v44 = vsub.f32 %v4608_v50, %v4979_v10 }
 0x186   :  { %3592 = vmatprep.subr.bf16.mxu1 %v3591_v36  ;;  %v1402_v49 = vand.u32 4294901760, %v1366_v58 }
 0x187   :  { %v1509_v54 = vsub.f32 %v4599_v26, %v4970_v5  ;;  %v1370_v5 = vld [vmem:[#allocation8 + $0x50] sm:$0xff]  ;;  %v1524_v25 = vand.u32 4294901760, %v1523_v44 }
 0x188   :  { %v4629_v27 = vpack.c.bf16 %v1405_v34, %v1402_v49  ;;  %v1414_v50 = vand.u32 4294901760, %v1370_v5 }
 0x189   :  { %3594 = vmatpush3.bf16.msra.mxu1 %v3591_v36  ;;  %v1488_v36 = vsub.f32 %v4591_v15, %v4961_v30  ;;  %v4631_v30 = vsub.f32 %v1366_v58, %v1402_v49  ;;  %v1510_v43 = vand.u32 4294901760, %v1509_v54  ;;  %v4639_v58 = vsub.f32 %v1367_v56, %v1405_v34  ;;  %v1371_v49 = vld [vmem:[#allocation8 + $0x58] sm:$0xff] }
 0x18a   :  { %3596 = vmatprep.subr.bf16.mxu1 %v4514_v2  ;;  %v3755_v54 = vpack.c.bf16 %v1524_v25, %v1517_v21  ;;  %v4656_v44 = vsub.f32 %v1370_v5, %v1414_v50 }
 0x18b   :  { %v1489_v20 = vand.u32 4294901760, %v1488_v36  ;;  %v1529_v33 = vand.u32 4294901760, %v4631_v30  ;;  %v1411_v36 = vand.u32 4294901760, %v1369_v39  ;;  %v3751_v53 = vpack.c.bf16 %v1510_v43, %v1503_v17 }
 0x18c   :  { %v1536_v10 = vand.u32 4294901760, %v4639_v58 }
 0x18d   :  { %3598 = vmatpush3.bf16.msra.mxu1 %v4514_v2  ;;  %v3747_v26 = vpack.c.bf16 %v1496_v57, %v1489_v20  ;;  %v1408_v2 = vand.u32 4294901760, %v1368_v24  ;;  %v1530_v22 = vsub.f32 %v4631_v30, %v1529_v33  ;;  %v1417_v20 = vand.u32 4294901760, %v1371_v49 }
 0x18e   :  { %3600 = vmatprep.subr.bf16.mxu1 %v4518_v12  ;;  %v1537_v17 = vsub.f32 %v4639_v58, %v1536_v10  ;;  %v4654_v43 = vsub.f32 %v1369_v39, %v1411_v36 }
 0x18f   :  { %3748 = vmatprep.subr.bf16.mxu0 %v3747_v26  ;;  %v4646_v42 = vpack.c.bf16 %v1411_v36, %v1408_v2  ;;  %v4648_v56 = vsub.f32 %v1368_v24, %v1408_v2  ;;  %v4659_v57 = vpack.c.bf16 %v1417_v20, %v1414_v50  ;;  %v4661_v24 = vsub.f32 %v1371_v49, %v1417_v20 }
 0x190   :  { %3750 = vmatpush3.bf16.msra.mxu0 %v3747_v26  ;;  %v1538_v21 = vand.u32 4294901760, %v1537_v17  ;;  %v1550_v34 = vand.u32 4294901760, %v4654_v43  ;;  %v1557_v26 = vand.u32 4294901760, %v4656_v44 }
 0x191   :  { %3602 = vmatpush3.bf16.msra.mxu1 %v4518_v12  ;;  %3752 = vmatprep.subr.bf16.mxu0 %v3751_v53  ;;  %v1531_v12 = vand.u32 4294901760, %v1530_v22  ;;  %v1543_v25 = vand.u32 4294901760, %v4648_v56  ;;  %v1564_v5 = vand.u32 4294901760, %v4661_v24 }
 0x192   :  { %3604 = vmatprep.subr.bf16.mxu1 %v4522_v14  ;;  %v1551_v50 = vsub.f32 %v4654_v43, %v1550_v34 }
 0x193   :  { %v1544_v39 = vsub.f32 %v4648_v56, %v1543_v25  ;;  %v3759_v49 = vpack.c.bf16 %v1538_v21, %v1531_v12  ;;  %v1565_v36 = vsub.f32 %v4661_v24, %v1564_v5  ;;  %v4998_v21 = vand.u32 4294901760, %v4547_v61 }
 0x194   :  { %3754 = vmatpush3.bf16.msra.mxu0 %v3751_v53  ;;  %v1552_v22 = vand.u32 4294901760, %v1551_v50  ;;  %v4999_v50 = vand.u32 4294901760, %v4556_v52 }
 0x195   :  { %3606 = vmatpush3.bf16.msra.mxu1 %v4522_v14  ;;  %3756 = vmatprep.subr.bf16.mxu0 %v3755_v54  ;;  %v1545_v2 = vand.u32 4294901760, %v1544_v39  ;;  %v1558_v14 = vsub.f32 %v4656_v44, %v1557_v26  ;;  %v1566_v17 = vand.u32 4294901760, %v1565_v36 }
 0x196   :  { %3608 = vmatprep.subr.bf16.mxu1 %v4526_v13 }
 0x197   :  { %v3763_v53 = vpack.c.bf16 %v1552_v22, %v1545_v2  ;;  %v1559_v20 = vand.u32 4294901760, %v1558_v14  ;;  %v5002_v2 = vand.u32 4294901760, %v4442_v45  ;;  %v5005_v14 = vand.u32 4294901760, %v4455_v31 }
 0x198   :  { %3758 = vmatpush3.bf16.msra.mxu0 %v3755_v54  ;;  %v4997_v54 = vand.u32 4294901760, %v4542_v32  ;;  %v5003_v32 = vand.u32 4294901760, %v4444_v46  ;;  %v5008_v45 = vand.u32 4294901760, %v4484_v8  ;;  %v5009_v46 = vand.u32 4294901760, %v4486_v9 }
 0x199   :  { %3610 = vmatpush3.bf16.msra.mxu1 %v4526_v13  ;;  %3760 = vmatprep.subr.bf16.mxu0 %v3759_v49  ;;  %v3767_v12 = vpack.c.bf16 %v1566_v17, %v1559_v20  ;;  %v4994_v13 = vand.u32 4294901760, %v4565_v62  ;;  %v5011_v31 = vand.u32 4294901760, %v4497_v41 }
 0x19a   :  { %3612 = vmatprep.subr.bf16.mxu1 %v4530_v59  ;;  %v3655_v39 = vpack.c.bf16 %v4998_v21, %v4997_v54  ;;  %v3663_v61 = vpack.c.bf16 %v5003_v32, %v5002_v2 }
 0x19c   :  { %3762 = vmatpush3.bf16.msra.mxu0 %v3759_v49 }
 0x19d   :  { %3614 = vmatpush3.bf16.msra.mxu1 %v4530_v59  ;;  %3764 = vmatprep.subr.bf16.mxu0 %v3763_v53  ;;  %v4995_v59 = vand.u32 4294901760, %v4406_v18  ;;  %v5000_v18 = vand.u32 4294901760, %v4429_v37  ;;  %v5006_v37 = vand.u32 4294901760, %v4468_v3 }
 0x19e   :  { %3616 = vmatprep.subr.bf16.mxu1 %v4534_v7 }
 0x1a0   :  { %3766 = vmatpush3.bf16.msra.mxu0 %v3763_v53  ;;  %v3675_v53 = vpack.c.bf16 %v5009_v46, %v5008_v45 }
 0x1a1   :  { %3618 = vmatpush3.bf16.msra.mxu1 %v4534_v7  ;;  %3768 = vmatprep.subr.bf16.mxu0 %v3767_v12  ;;  %v4996_v7 = vand.u32 4294901760, %v4411_v19  ;;  %v5001_v19 = vand.u32 4294901760, %v4431_v38  ;;  %v5007_v38 = vand.u32 4294901760, %v4470_v4 }
 0x1a2   :  { %3620 = vmatprep.subr.bf16.mxu1 %v4359_v51 }
 0x1a3   :  { %v3651_v62 = vpack.c.bf16 %v4996_v7, %v4995_v59  ;;  %v3659_v49 = vpack.c.bf16 %v5001_v19, %v5000_v18  ;;  %v3671_v22 = vpack.c.bf16 %v5007_v38, %v5006_v37  ;;  %v3779_v18 = vpack.c.bf16 %v4593_v23, %v4591_v15 }
 0x1a4   :  { %3092 = vmatmul.mubr.f32.vlgmr.msra.gmra.mrb[2].mxu1 %v4556_v52  ;;  %3770 = vmatpush3.bf16.msra.mxu0 %v3767_v12  ;;  %v5004_v52 = vand.u32 4294901760, %v4453_v60  ;;  %v5010_v60 = vand.u32 4294901760, %v4495_v35 }
 0x1a5   :  { %3622 = vmatpush3.bf16.msra.mxu1 %v4359_v51  ;;  %3126 = vmatprep.mubr.f32.mxu1 %v4994_v13 }
 0x1a6   :  { %3624 = vmatprep.subr.bf16.mxu1 %v4370_v55  ;;  %v3667_v36 = vpack.c.bf16 %v5005_v14, %v5004_v52  ;;  %v3679_v20 = vpack.c.bf16 %v5011_v31, %v5010_v60  ;;  %v5012_v60 = vld [vmem:[#allocation24_spill] sm:$0xff]  ;;  %v5013_v31 = vld [vmem:[#allocation25_spill] sm:$0xff] }
 0x1a9   :  { %3626 = vmatpush3.bf16.msra.mxu1 %v4370_v55 }
 0x1aa   :  { %3628 = vmatprep.subr.bf16.mxu1 %v4385_v0 }
 0x1ad   :  { %3630 = vmatpush3.bf16.msra.mxu1 %v4385_v0 }
 0x1ae   :  { %3632 = vmatprep.subr.bf16.mxu1 %v4387_v1 }
 0x1b1   :  { %3634 = vmatpush3.bf16.msra.mxu1 %v4387_v1 }
 0x1b2   :  { %3636 = vmatprep.subr.bf16.mxu1 %v4393_v6 }
 0x1b5   :  { %3638 = vmatpush3.bf16.msra.mxu1 %v4393_v6 }
 0x1b6   :  { %3640 = vmatprep.subr.bf16.mxu1 %v4397_v11 }
 0x1b9   :  { %3642 = vmatpush3.bf16.msra.mxu1 %v4397_v11 }
 0x1ba   :  { %3644 = vmatprep.subr.bf16.mxu1 %v4401_v16 }
 0x1bd   :  { %3646 = vmatpush3.bf16.msra.mxu1 %v4401_v16 }
 0x1be   :  { %3648 = vmatprep.subr.bf16.mxu1 %v4417_v29 }
 0x1c1   :  { %3650 = vmatpush3.bf16.msra.mxu1 %v4417_v29 }
 0x1c2   :  { %3652 = vmatprep.subr.bf16.mxu1 %v3651_v62 }
 0x1c4   :  { %3127 = vmatmul.mubr.f32.vlgmr.msra.gmra.mrb[2].mxu1 %v4999_v50 }
 0x1c5   :  { %3654 = vmatpush3.bf16.msra.mxu1 %v3651_v62  ;;  %3161 = vmatprep.mubr.f32.mxu1 %v4553_v48 }
 0x1c6   :  { %3656 = vmatprep.subr.bf16.mxu1 %v3655_v39 }
 0x1c9   :  { %3658 = vmatpush3.bf16.msra.mxu1 %v3655_v39 }
 0x1ca   :  { %3660 = vmatprep.subr.bf16.mxu1 %v3659_v49 }
 0x1cd   :  { %3662 = vmatpush3.bf16.msra.mxu1 %v3659_v49 }
 0x1ce   :  { %3664 = vmatprep.subr.bf16.mxu1 %v3663_v61 }
 0x1d1   :  { %3666 = vmatpush3.bf16.msra.mxu1 %v3663_v61  ;;  %v2632_v61 = vld [vmem:[%s4934_s4] ss:$0 sm:$0xff] }
 0x1d2   :  { %3668 = vmatprep.subr.bf16.mxu1 %v3667_v36 }
 0x1d5   :  { %3670 = vmatpush3.bf16.msra.mxu1 %v3667_v36 }
 0x1d6   :  { %3672 = vmatprep.subr.bf16.mxu1 %v3671_v22 }
 0x1d9   :  { %3674 = vmatpush3.bf16.msra.mxu1 %v3671_v22 }
 0x1da   :  { %3676 = vmatprep.subr.bf16.mxu1 %v3675_v53 }
 0x1dd   :  { %3678 = vmatpush3.bf16.msra.mxu1 %v3675_v53 }
 0x1de   :  { %3680 = vmatprep.subr.bf16.mxu1 %v3679_v20 }
 0x1e1   :  { %3682 = vmatpush3.bf16.msra.mxu1 %v3679_v20  ;;  %v3783_v20 = vpack.c.bf16 %v5013_v31, %v5012_v60 }
 0x1e2   :  { %3684 = vmatprep.subr.bf16.mxu1 %v4359_v51 }
 0x1e4   :  { %3162 = vmatmul.mubr.f32.vlgmr.msra.gmra.mrb[2].mxu1 %v4551_v28 }
 0x1e5   :  { %3686 = vmatpush3.bf16.msra.mxu1 %v4359_v51  ;;  %3196 = vmatprep.mubr.f32.mxu1 %v4553_v48  ;;  %v1372_v51 = vld [vmem:[#allocation8 + $0x60] sm:$0xff] }
 0x1e6   :  { %3688 = vmatprep.subr.bf16.mxu1 %v4370_v55 }
 0x1e9   :  { %3690 = vmatpush3.bf16.msra.mxu1 %v4370_v55  ;;  %v1373_v55 = vld [vmem:[#allocation8 + $0x68] sm:$0xff] }
 0x1ea   :  { %3692 = vmatprep.subr.bf16.mxu1 %v4385_v0 }
 0x1ed   :  { %3694 = vmatpush3.bf16.msra.mxu1 %v4385_v0  ;;  %v1420_v0 = vand.u32 4294901760, %v1372_v51 }
 0x1ee   :  { %3696 = vmatprep.subr.bf16.mxu1 %v4387_v1 }
 0x1f1   :  { %3698 = vmatpush3.bf16.msra.mxu1 %v4387_v1  ;;  %v1423_v1 = vand.u32 4294901760, %v1373_v55 }
 0x1f2   :  { %3700 = vmatprep.subr.bf16.mxu1 %v4393_v6 }
 0x1f3   :  { %v4796_v19 = vpack.c.bf16 %v1423_v1, %v1420_v0 }
 0x1f5   :  { %3702 = vmatpush3.bf16.msra.mxu1 %v4393_v6  ;;  %v4770_v6 = vsub.f32 %v1372_v51, %v1420_v0 }
 0x1f6   :  { %3704 = vmatprep.subr.bf16.mxu1 %v4397_v11 }
 0x1f9   :  { %3706 = vmatpush3.bf16.msra.mxu1 %v4397_v11  ;;  %v4772_v11 = vsub.f32 %v1373_v55, %v1423_v1 }
 0x1fa   :  { %3708 = vmatprep.subr.bf16.mxu1 %v4401_v16 }
 0x1fb   :  { %v1578_v3 = vand.u32 4294901760, %v4772_v11  ;;  %v3803_v2 = vpack.c.bf16 %v4772_v11, %v4770_v6 }
 0x1fd   :  { %3710 = vmatpush3.bf16.msra.mxu1 %v4401_v16  ;;  %v1374_v16 = vld [vmem:[#allocation8 + $0x70] sm:$0xff]  ;;  %v1579_v35 = vsub.f32 %v4772_v11, %v1578_v3 }
 0x1fe   :  { %3712 = vmatprep.subr.bf16.mxu1 %v4417_v29  ;;  %v1426_v4 = vand.u32 4294901760, %v1374_v16 }
 0x1ff   :  { %v1580_v12 = vand.u32 4294901760, %v1579_v35 }
 0x200   :  { %v4782_v41 = vsub.f32 %v1374_v16, %v1426_v4  ;;  %v5014_v16 = vld [vmem:[#allocation26_spill] sm:$0xff] }
 0x201   :  { %3714 = vmatpush3.bf16.msra.mxu1 %v4417_v29  ;;  %v1571_v29 = vand.u32 4294901760, %v4770_v6 }
 0x202   :  { %3716 = vmatprep.subr.bf16.mxu1 %v4589_v47  ;;  %v1585_v13 = vand.u32 4294901760, %v4782_v41 }
 0x203   :  { %v1572_v9 = vsub.f32 %v4770_v6, %v1571_v29 }
 0x204   :  { %3197 = vmatmul.mubr.f32.vlgmr.msra.gmra.mrb[2].mxu1 %v4551_v28  ;;  %v1375_v28 = vld [vmem:[#allocation8 + $0x78] sm:$0xff]  ;;  %v1586_v62 = vsub.f32 %v4782_v41, %v1585_v13 }
 0x205   :  { %3718 = vmatpush3.bf16.msra.mxu1 %v4589_v47  ;;  %v1429_v8 = vand.u32 4294901760, %v1375_v28  ;;  %v1573_v17 = vand.u32 4294901760, %v1572_v9 }
 0x206   :  { %3720 = vmatprep.subr.bf16.mxu1 %v4597_v40  ;;  %v1587_v21 = vand.u32 4294901760, %v1586_v62  ;;  %v5016_v62 = vand.u32 4294901760, %v4591_v15 }
 0x207   :  { %v4784_v48 = vsub.f32 %v1375_v28, %v1429_v8  ;;  %v3771_v7 = vpack.c.bf16 %v1580_v12, %v1573_v17  ;;  %v4800_v49 = vpack.c.bf16 %v1429_v8, %v1426_v4  ;;  %v5015_v28 = vld [vmem:[#allocation27_spill] sm:$0xff]  ;;  %v3791_v17 = vpack.c.bf16 %v4639_v58, %v4631_v30 }
 0x208   :  { %v3787_v4 = vpack.c.bf16 %v5015_v28, %v5014_v16  ;;  %v3795_v12 = vpack.c.bf16 %v4654_v43, %v4648_v56  ;;  %v5021_v15 = vand.u32 4294901760, %v5015_v28  ;;  %v3867_v30 = vpack.c.bf16 %v1578_v3, %v1571_v29  ;;  %v2068_v58 = vld [vmem:[#allocation10 + $0x8] sm:$0xff]  ;;  %v2069_v43 = vld [vmem:[#allocation10 + $0x10] sm:$0xff] }
 0x209   :  { %3722 = vmatpush3.bf16.msra.mxu1 %v4597_v40  ;;  %v1592_v59 = vand.u32 4294901760, %v4784_v48  ;;  %3772 = vmatprep.subr.bf16.mxu0 %v3771_v7  ;;  %v3807_v32 = vpack.c.bf16 %v4784_v48, %v4782_v41  ;;  %v2633_v28 = vld [vmem:[%s4936_s6] ss:$0 sm:$0xff] }
 0x20a   :  { %3724 = vmatprep.subr.bf16.mxu1 %v4601_v63  ;;  %3774 = vmatpush3.bf16.msra.mxu0 %v3771_v7  ;;  %v3799_v7 = vpack.c.bf16 %v4661_v24, %v4656_v44  ;;  %v2070_v44 = vld [vmem:[#allocation10 + $0x18] sm:$0xff] }
 0x20b   :  { %v1593_v54 = vsub.f32 %v4784_v48, %v1592_v59 }
 0x20d   :  { %3726 = vmatpush3.bf16.msra.mxu1 %v4601_v63  ;;  %v1594_v39 = vand.u32 4294901760, %v1593_v54  ;;  %v5017_v54 = vand.u32 4294901760, %v4593_v23  ;;  %v3855_v23 = vpack.c.bf16 %v1536_v10, %v1529_v33  ;;  %v3871_v33 = vpack.c.bf16 %v1592_v59, %v1585_v13  ;;  %v2067_v10 = vld [vmem:[#allocation10] sm:$0xff] }
 0x20e   :  { %3728 = vmatprep.subr.bf16.mxu1 %v4629_v27  ;;  %v2073_v56 = vand.u32 4294901760, %v2067_v10 }
 0x20f   :  { %v3775_v50 = vpack.c.bf16 %v1594_v39, %v1587_v21  ;;  %v3843_v21 = vpack.c.bf16 %v5017_v54, %v5016_v62  ;;  %v5018_v39 = vand.u32 4294901760, %v5012_v60  ;;  %v5026_v60 = vld [vmem:[#allocation18_spill] sm:$0xff] }
 0x210   :  { %v2163_v24 = vsub.f32 %v2067_v10, %v2073_v56 }
 0x211   :  { %3730 = vmatpush3.bf16.msra.mxu1 %v4629_v27  ;;  %3776 = vmatprep.subr.bf16.mxu0 %v3775_v50 }
 0x212   :  { %3732 = vmatprep.subr.bf16.mxu1 %v4646_v42  ;;  %3778 = vmatpush3.bf16.msra.mxu0 %v3775_v50  ;;  %v5019_v50 = vand.u32 4294901760, %v5013_v31  ;;  %v5027_v31 = vld [vmem:[#allocation19_spill] sm:$0xff] }
 0x213   :  { %3780 = vmatprep.subr.bf16.mxu0 %v3779_v18 }
 0x215   :  { %3734 = vmatpush3.bf16.msra.mxu1 %v4646_v42 }
 0x216   :  { %3736 = vmatprep.subr.bf16.mxu1 %v4659_v57 }
 0x219   :  { %3738 = vmatpush3.bf16.msra.mxu1 %v4659_v57 }
 0x21a   :  { %3740 = vmatprep.subr.bf16.mxu1 %v4796_v19 }
 0x21d   :  { %3742 = vmatpush3.bf16.msra.mxu1 %v4796_v19 }
 0x21e   :  { %3744 = vmatprep.subr.bf16.mxu1 %v4800_v49 }
 0x221   :  { %3746 = vmatpush3.bf16.msra.mxu1 %v4800_v49 }
 0x2d7   :  { %v3198_v52 = vpop.f32.mrb[2].mxu1 }
 0x2d8   :  { %v3959_v14 = vadd.f32 %v3198_v52, %v2632_v61  ;;  %v1348_v36 = vpop.f32.mrb[3].mxu1  ;;  %v3863_v52 = vpack.c.bf16 %v1564_v5, %v1557_v26 }
 0x2d9   :  { %v3960_v37 = vadd.f32 %v2632_v61, %v1348_v36  ;;  %v3859_v61 = vpack.c.bf16 %v1550_v34, %v1543_v25  ;;  %v2082_v25 = vand.u32 4294901760, %v2070_v44  ;;  %v2164_v34 = vand.u32 4294901760, %v2163_v24 }
 0x2da   :  { %v1359_v38 = vmax.f32 %v3959_v14, 0.0  ;;  %v5022_v14 = vld [vmem:[#allocation22_spill] sm:$0xff] }
 0x2db   :  { %v1358_v22 = vmax.f32 %v3960_v37, 0.0  ;;  %v2184_v5 = vsub.f32 %v2070_v44, %v2082_v25 }
 0x2dc   :  { %v4811_v45 = vand.u32 4294901760, %v1359_v38 }
 0x2dd   :  { %v4813_v46 = vand.u32 4294901760, %v1358_v22  ;;  %v2185_v3 = vand.u32 4294901760, %v2184_v5 }
 0x2de   :  { %v1475_v53 = vsub.f32 %v1359_v38, %v4811_v45 }
 0x2df   :  { %v1465_v51 = vsub.f32 %v1358_v22, %v4813_v46  ;;  %3266 = vmatprep.mubr.f32.mxu0 %v4813_v46  ;;  %v2186_v59 = vsub.f32 %v2184_v5, %v2185_v3  ;;  %v5023_v22 = vld [vmem:[#allocation23_spill] sm:$0xff] }
 0x2e0   :  { %v1476_v55 = vand.u32 4294901760, %v1475_v53  ;;  %3267 = vmatmul.mubr.f32.vlgmr.msra.gmra.mrb[2].mxu0 %v4811_v45 }
 0x2e1   :  { %3782 = vmatpush3.bf16.msra.mxu0 %v3779_v18  ;;  %3301 = vmatprep.mubr.f32.mxu0 %v1465_v51  ;;  %v1466_v0 = vand.u32 4294901760, %v1465_v51  ;;  %v3847_v18 = vpack.c.bf16 %v5019_v50, %v5018_v39  ;;  %v2187_v37 = vand.u32 4294901760, %v2186_v59 }
 0x2e2   :  { %v1477_v1 = vsub.f32 %v1475_v53, %v1476_v55  ;;  %3784 = vmatprep.subr.bf16.mxu0 %v3783_v20 }
 0x2e3   :  { %v1467_v8 = vsub.f32 %v1465_v51, %v1466_v0 }
 0x2e4   :  { %v1478_v35 = vand.u32 4294901760, %v1477_v1 }
 0x2e5   :  { %3786 = vmatpush3.bf16.msra.mxu0 %v3783_v20  ;;  %v1468_v9 = vand.u32 4294901760, %v1467_v8  ;;  %v5028_v20 = vld [vmem:[#allocation20_spill] sm:$0xff] }
 0x2e6   :  { %3788 = vmatprep.subr.bf16.mxu0 %v3787_v4 }
 0x2e7   :  { %3231 = vmatprep.mubr.f32.mxu1 %v1468_v9  ;;  %v2634_v9 = vld [vmem:[%s4938_s8] ss:$0 sm:$0xff] }
 0x2e8   :  { %3232 = vmatmul.mubr.f32.vlgmr.msra.gmra.mrb[4].mxu1 %v1478_v35 }
 0x2e9   :  { %3790 = vmatpush3.bf16.msra.mxu0 %v3787_v4 }
 0x2ea   :  { %3792 = vmatprep.subr.bf16.mxu0 %v3791_v17 }
 0x2ed   :  { %3794 = vmatpush3.bf16.msra.mxu0 %v3791_v17 }
 0x2ee   :  { %3796 = vmatprep.subr.bf16.mxu0 %v3795_v12 }
 0x2f1   :  { %3798 = vmatpush3.bf16.msra.mxu0 %v3795_v12 }
 0x2f2   :  { %3800 = vmatprep.subr.bf16.mxu0 %v3799_v7 }
 0x2f5   :  { %3802 = vmatpush3.bf16.msra.mxu0 %v3799_v7 }
 0x2f6   :  { %3804 = vmatprep.subr.bf16.mxu0 %v3803_v2 }
 0x2f9   :  { %3806 = vmatpush3.bf16.msra.mxu0 %v3803_v2  ;;  %v5020_v2 = vand.u32 4294901760, %v5014_v16 }
 0x2fa   :  { %3808 = vmatprep.subr.bf16.mxu0 %v3807_v32 }
 0x2fd   :  { %3810 = vmatpush3.bf16.msra.mxu0 %v3807_v32  ;;  %v3851_v32 = vpack.c.bf16 %v5021_v15, %v5020_v2 }
 0x2fe   :  { %3812 = vmatprep.subr.bf16.mxu0 %v4589_v47 }
 0x300   :  { %3302 = vmatmul.mubr.f32.vlgmr.msra.gmra.mrb[2].mxu0 %v1475_v53  ;;  %v5025_v53 = vld [vmem:[#allocation17_spill] sm:$0xff] }
 0x301   :  { %3814 = vmatpush3.bf16.msra.mxu0 %v4589_v47  ;;  %3336 = vmatprep.mubr.f32.mxu0 %v1466_v0  ;;  %v5029_v0 = vld [vmem:[#allocation21_spill] sm:$0xff] }
 0x302   :  { %3816 = vmatprep.subr.bf16.mxu0 %v4597_v40 }
 0x305   :  { %3818 = vmatpush3.bf16.msra.mxu0 %v4597_v40 }
 0x306   :  { %3820 = vmatprep.subr.bf16.mxu0 %v4601_v63 }
 0x309   :  { %3822 = vmatpush3.bf16.msra.mxu0 %v4601_v63 }
 0x30a   :  { %3824 = vmatprep.subr.bf16.mxu0 %v4629_v27 }
 0x30d   :  { %3826 = vmatpush3.bf16.msra.mxu0 %v4629_v27 }
 0x30e   :  { %3828 = vmatprep.subr.bf16.mxu0 %v4646_v42 }
 0x311   :  { %3830 = vmatpush3.bf16.msra.mxu0 %v4646_v42 }
 0x312   :  { %3832 = vmatprep.subr.bf16.mxu0 %v4659_v57 }
 0x315   :  { %3834 = vmatpush3.bf16.msra.mxu0 %v4659_v57 }
 0x316   :  { %3836 = vmatprep.subr.bf16.mxu0 %v4796_v19 }
 0x319   :  { %3838 = vmatpush3.bf16.msra.mxu0 %v4796_v19 }
 0x31a   :  { %3840 = vmatprep.subr.bf16.mxu0 %v4800_v49 }
 0x31d   :  { %3842 = vmatpush3.bf16.msra.mxu0 %v4800_v49 }
 0x31e   :  { %3844 = vmatprep.subr.bf16.mxu0 %v3843_v21 }
 0x320   :  { %3337 = vmatmul.mubr.f32.vlgmr.msra.gmra.mrb[2].mxu0 %v1476_v55 }
 0x321   :  { %3846 = vmatpush3.bf16.msra.mxu0 %v3843_v21  ;;  %3371 = vmatprep.mubr.f32.mxu0 %v4813_v46 }
 0x322   :  { %3848 = vmatprep.subr.bf16.mxu0 %v3847_v18 }
 0x325   :  { %3850 = vmatpush3.bf16.msra.mxu0 %v3847_v18 }
 0x326   :  { %3852 = vmatprep.subr.bf16.mxu0 %v3851_v32 }
 0x329   :  { %3854 = vmatpush3.bf16.msra.mxu0 %v3851_v32 }
 0x32a   :  { %3856 = vmatprep.subr.bf16.mxu0 %v3855_v23 }
 0x32d   :  { %3858 = vmatpush3.bf16.msra.mxu0 %v3855_v23 }
 0x32e   :  { %3860 = vmatprep.subr.bf16.mxu0 %v3859_v61 }
 0x331   :  { %3862 = vmatpush3.bf16.msra.mxu0 %v3859_v61 }
 0x332   :  { %3864 = vmatprep.subr.bf16.mxu0 %v3863_v52 }
 0x335   :  { %3866 = vmatpush3.bf16.msra.mxu0 %v3863_v52 }
 0x336   :  { %3868 = vmatprep.subr.bf16.mxu0 %v3867_v30 }
 0x339   :  { %3870 = vmatpush3.bf16.msra.mxu0 %v3867_v30 }
 0x33a   :  { %3872 = vmatprep.subr.bf16.mxu0 %v3871_v33 }
 0x33d   :  { %3874 = vmatpush3.bf16.msra.mxu0 %v3871_v33 }
 0x33e   :  { %3876 = vmatprep.subr.bf16.mxu0 %v4589_v47 }
 0x340   :  { %3372 = vmatmul.mubr.f32.vlgmr.msra.gmra.mrb[2].mxu0 %v4811_v45 }
 0x341   :  { %3878 = vmatpush3.bf16.msra.mxu0 %v4589_v47  ;;  %3406 = vmatprep.mubr.f32.mxu0 %v4813_v46  ;;  %v2076_v47 = vand.u32 4294901760, %v2068_v58 }
 0x342   :  { %3880 = vmatprep.subr.bf16.mxu0 %v4597_v40 }
 0x343   :  { %v3907_v6 = vpack.c.bf16 %v2076_v47, %v2073_v56 }
 0x345   :  { %3882 = vmatpush3.bf16.msra.mxu0 %v4597_v40  ;;  %v2079_v40 = vand.u32 4294901760, %v2069_v43 }
 0x346   :  { %3884 = vmatprep.subr.bf16.mxu0 %v4601_v63 }
 0x347   :  { %v2177_v26 = vsub.f32 %v2069_v43, %v2079_v40  ;;  %v3911_v41 = vpack.c.bf16 %v2082_v25, %v2079_v40 }
 0x349   :  { %3886 = vmatpush3.bf16.msra.mxu0 %v4601_v63  ;;  %v2170_v63 = vsub.f32 %v2068_v58, %v2076_v47  ;;  %v2178_v29 = vand.u32 4294901760, %v2177_v26 }
 0x34a   :  { %3888 = vmatprep.subr.bf16.mxu0 %v4629_v27 }
 0x34b   :  { %v2179_v13 = vsub.f32 %v2177_v26, %v2178_v29  ;;  %v3923_v46 = vpack.c.bf16 %v2170_v63, %v2163_v24  ;;  %v3943_v55 = vpack.c.bf16 %v2185_v3, %v2178_v29 }
 0x34d   :  { %3890 = vmatpush3.bf16.msra.mxu0 %v4629_v27  ;;  %v2171_v27 = vand.u32 4294901760, %v2170_v63  ;;  %v2180_v36 = vand.u32 4294901760, %v2179_v13 }
 0x34e   :  { %3892 = vmatprep.subr.bf16.mxu0 %v4646_v42 }
 0x34f   :  { %v2172_v11 = vsub.f32 %v2170_v63, %v2171_v27  ;;  %v3919_v38 = vpack.c.bf16 %v2187_v37, %v2180_v36  ;;  %v3939_v51 = vpack.c.bf16 %v2171_v27, %v2164_v34 }
 0x351   :  { %3894 = vmatpush3.bf16.msra.mxu0 %v4646_v42  ;;  %v2165_v42 = vsub.f32 %v2163_v24, %v2164_v34  ;;  %v2173_v48 = vand.u32 4294901760, %v2172_v11 }
 0x352   :  { %3896 = vmatprep.subr.bf16.mxu0 %v4659_v57 }
 0x355   :  { %3898 = vmatpush3.bf16.msra.mxu0 %v4659_v57  ;;  %v2166_v57 = vand.u32 4294901760, %v2165_v42 }
 0x356   :  { %3900 = vmatprep.subr.bf16.mxu0 %v4796_v19 }
 0x359   :  { %3902 = vmatpush3.bf16.msra.mxu0 %v4796_v19  ;;  %v3915_v19 = vpack.c.bf16 %v2173_v48, %v2166_v57 }
 0x35a   :  { %3904 = vmatprep.subr.bf16.mxu0 %v4800_v49 }
 0x35d   :  { %3906 = vmatpush3.bf16.msra.mxu0 %v4800_v49  ;;  %v5024_v49 = vld [vmem:[#allocation16_spill] sm:$0xff] }
 0x35e   :  { %3908 = vmatprep.subr.bf16.mxu0 %v3907_v6 }
 0x360   :  { %3407 = vmatmul.mubr.f32.vlgmr.msra.gmra.mrb[2].mxu0 %v4811_v45  ;;  %v3927_v45 = vpack.c.bf16 %v2184_v5, %v2177_v26 }
 0x361   :  { %3910 = vmatpush3.bf16.msra.mxu0 %v3907_v6  ;;  %3417 = vmatprep.mubr.f32.mxu0 %v5022_v14 }
 0x362   :  { %3912 = vmatprep.subr.bf16.mxu0 %v3911_v41 }
 0x365   :  { %3914 = vmatpush3.bf16.msra.mxu0 %v3911_v41 }
 0x366   :  { %3916 = vmatprep.subr.bf16.mxu0 %v3915_v19 }
 0x368   :  { %3418 = vmatmul.mubr.f32.vlgmr.msra.gmra.mrb[2].mxu0 %v5023_v22 }
 0x369   :  { %3918 = vmatpush3.bf16.msra.mxu0 %v3915_v19  ;;  %3428 = vmatprep.mubr.f32.mxu0 %v5024_v49 }
 0x36a   :  { %3920 = vmatprep.subr.bf16.mxu0 %v3919_v38 }
 0x36d   :  { %3922 = vmatpush3.bf16.msra.mxu0 %v3919_v38 }
 0x36e   :  { %3924 = vmatprep.subr.bf16.mxu0 %v3923_v46 }
 0x370   :  { %3429 = vmatmul.mubr.f32.vlgmr.msra.gmra.mrb[2].mxu0 %v5025_v53 }
 0x371   :  { %3926 = vmatpush3.bf16.msra.mxu0 %v3923_v46  ;;  %3439 = vmatprep.mubr.f32.mxu0 %v5026_v60 }
 0x372   :  { %3928 = vmatprep.subr.bf16.mxu0 %v3927_v45 }
 0x375   :  { %3930 = vmatpush3.bf16.msra.mxu0 %v3927_v45 }
 0x376   :  { %3932 = vmatprep.subr.bf16.mxu0 %v3907_v6 }
 0x378   :  { %3440 = vmatmul.mubr.f32.vlgmr.msra.gmra.mrb[2].mxu0 %v5027_v31 }
 0x379   :  { %3934 = vmatpush3.bf16.msra.mxu0 %v3907_v6  ;;  %3450 = vmatprep.mubr.f32.mxu0 %v5028_v20 }
 0x37a   :  { %3936 = vmatprep.subr.bf16.mxu0 %v3911_v41 }
 0x37d   :  { %3938 = vmatpush3.bf16.msra.mxu0 %v3911_v41 }
 0x37e   :  { %3940 = vmatprep.subr.bf16.mxu0 %v3939_v51 }
 0x380   :  { %3451 = vmatmul.mubr.f32.vlgmr.msra.gmra.mrb[2].mxu0 %v5029_v0 }
 0x381   :  { %3942 = vmatpush3.bf16.msra.mxu0 %v3939_v51  ;;  %3461 = vmatprep.mubr.f32.mxu0 %v5024_v49 }
 0x382   :  { %3944 = vmatprep.subr.bf16.mxu0 %v3943_v55 }
 0x385   :  { %3946 = vmatpush3.bf16.msra.mxu0 %v3943_v55 }
 0x386   :  { %3948 = vmatprep.subr.bf16.mxu0 %v3907_v6 }
 0x388   :  { %3462 = vmatmul.mubr.f32.vlgmr.msra.gmra.mrb[2].mxu0 %v5025_v53 }
 0x389   :  { %3950 = vmatpush3.bf16.msra.mxu0 %v3907_v6  ;;  %3472 = vmatprep.mubr.f32.mxu0 %v5024_v49 }
 0x38a   :  { %3952 = vmatprep.subr.bf16.mxu0 %v3911_v41 }
 0x38d   :  { %3954 = vmatpush3.bf16.msra.mxu0 %v3911_v41 }
 0x390   :  { %3473 = vmatmul.mubr.f32.vlgmr.msra.gmra.mrb[2].mxu0 %v5025_v53 }
 0x3bb   :  { %v3233_v1 = vpop.f32.mrb[4].mxu1 }
 0x3bc   :  { %v1470_v16 = vpop.f32.mrb[5].mxu1  ;;  %v1481_v4 = vadd.f32 %v3233_v1, %v2633_v28 }
 0x3bd   :  { %v1471_v8 = vadd.f32 %v2633_v28, %v1470_v16 }
 0x463   :  { %v3474_v35 = vpop.f32.mrb[2].mxu0 }
 0x464   :  { %v3962_v17 = vadd.f32 %v3474_v35, %v1481_v4  ;;  %v2590_v12 = vpop.f32.mrb[3].mxu0 }
 0x465   :  { %v3964_v7 = vadd.f32 %v2590_v12, %v1471_v8 }
 0x466   :  { %v2609_v62 = vadd.f32 %v3962_v17, %v2634_v9 }
 0x467   :  { %v2608_v54 = vadd.f32 %v3964_v7, %v2634_v9 }
 0x468   :  { %2611 = vst [vmem:[#allocation11 + $0x8] sm:$0x3] %v2609_v62 }
 0x469   :  { %2610 = vst [vmem:[#allocation11] sm:$0xff] %v2608_v54 }
 0x46a   :  { %4132 = shalt.err (!%p4129_p2)
}
 0x46b   :  { %s4133_s14 = scalar_lea.hbm %s4939_s9, 256 }
 0x46c   :  { %p4134_p3 = scmp.ne.s32.totalorder %s4939_s9, %s4133_s14  ;;  %p4137_p4 = scmp.lt.u32.totalorder %s4133_s14, %s4939_s9 }
 0x46e   :  { %p4139_p5 = pnand %p4137_p4, %p4134_p3 }
 0x470   :  { %4142 = shalt.err (!%p4139_p5)
}
 0x471   :  { %2623 = dma.vmem_to_hbm [thread:$0]  %s2618_s1, 256, %s4939_s9, [#allocation4], %s4153_s21, %s4153_s21, %s4154_s22  }
 0x472   :  { %4149 = dma.done.wait [#allocation4], 256  }
 0x473   :  { %4150 = vsyncadd [#allocation4], 4294967040 }
 0x474   :  { %2627 = vsyncpa [#allocation3], 1 }
 0x475   :  { %2628 = vsyncpa [#allocation6], 1 }
 0x476   :  { %2629 = vsyncpa [#allocation9], 1 }
 0x477   :  { %2630 = vsyncpa [#allocation4], 1 }

</bundles_post_ra>
